<compile_context>
chip_gen: v7x
topology: tpu7x:2x2x1
jax: 0.10.0
libtpu: 0.0.40
codegen_flags: <defaults>
</compile_context>

<pallas_src>
import jax
import jax.numpy as jnp
from jax.experimental import pallas as pl
from jax.experimental.pallas import tpu as pltpu

KSIZE = 5            # Conv1d kernel_size
NEG_SLOPE = 0.01     # F.leaky_relu default negative_slope
HIDDEN = 100
LANE = 128
SUBLANE = 8
TB_MAX = 4096        # max batch-tile rows (fits comfortably in 32 MiB scoped VMEM)
SPLIT_MIN_ROWS = 1024      # above this, use >=2 grid steps (v7x: 2 TensorCores)
NARROW_OUT_MIN_ROWS = 1024  # above this, store a_dim-wide output (less writeback)


def _round_up(x, m):
    return (x + m - 1) // m * m


def _cdiv(a, b):
    return -(-a // b)


def _leaky_relu(x):
    return jnp.where(x > 0, x, NEG_SLOPE * x)


def anet_kernel(s_ref, t_ref, cvec_ref, w1_ref, w2_ref, o_ref):
    # s_ref    : (TB, s_dim)        f32 batch rows
    # t_ref    : (s_dim, l_pad)     bf16 Toeplitz conv matrix (cols >= l_out zero)
    # cvec_ref : (1, l_pad)         f32 conv bias on lanes [0, l_out), 1.0 on the
    #                               constant lane (l_pad-1), zeros elsewhere
    # w1_ref   : (l_pad, h_pad)     bf16 fc1 W^T; b1 folded into row l_pad-1;
    #                               [l_pad-1, h_pad-1] == 1 (constant pass-through)
    # w2_ref   : (h_pad, a_pad)     bf16 out W^T; b2 folded into row h_pad-1
    # o_ref    : (TB, a_out)        f32 output (a_out == a_dim or 128)

    # Conv1d(1,1,5) as one MXU matmul (bf16 operands, f32 accumulate);
    # conv bias + constant-1 lane injected with a single broadcast add.
    s_bf = s_ref[...].astype(jnp.bfloat16)
    conv = jnp.dot(s_bf, t_ref[...], preferred_element_type=jnp.float32)
    x = _leaky_relu(conv + cvec_ref[...])              # (TB, l_pad), lane -1 == 1

    # fc1 (bias folded via constant lane) + leaky_relu.
    h = jnp.dot(x.astype(jnp.bfloat16), w1_ref[...],
                preferred_element_type=jnp.float32)
    h = _leaky_relu(h)                                 # (TB, h_pad), lane -1 == 1

    # out (bias folded via constant lane) + sigmoid; store only o_ref's width.
    y = jnp.dot(h.astype(jnp.bfloat16), w2_ref[...],
                preferred_element_type=jnp.float32)
    o_ref[...] = jax.nn.sigmoid(y[:, :o_ref.shape[-1]])


def prepare_params(params, s_dim, a_dim):
    """PyTorch-layout params -> kernel-ready padded arrays (done once, offline)."""
    cw, cb, w1, b1, w2, b2 = params
    l_out = s_dim - KSIZE + 1
    l_pad = _round_up(l_out + 1, LANE)     # +1 reserves the constant-1 lane
    h_pad = _round_up(HIDDEN + 1, LANE)
    a_pad = _round_up(a_dim, LANE)
    x_const = l_pad - 1                    # constant lane in the conv output
    h_const = h_pad - 1                    # constant lane in the hidden layer

    # Toeplitz: conv[:, j] = sum_k cw[k] * s[:, j+k]  =>  T[j+k, j] = cw[k]
    rows = jnp.arange(s_dim)[:, None]
    cols = jnp.arange(l_out)[None, :]
    diff = rows - cols
    t = jnp.where((diff >= 0) & (diff < KSIZE),
                  cw[jnp.clip(diff, 0, KSIZE - 1)],
                  jnp.float32(0.0)).astype(jnp.float32)
    t_pad = jnp.zeros((s_dim, l_pad), jnp.float32).at[:, :l_out].set(t)

    # Conv bias + constant-1 injection vector (added to the f32 conv accumulator).
    cvec = (jnp.zeros((1, l_pad), jnp.float32)
            .at[0, :l_out].set(cb[0])
            .at[0, x_const].set(1.0))

    # fc1: W1^T; b1 folded into the constant row; constant lane passed through.
    w1_t = (jnp.zeros((l_pad, h_pad), jnp.float32)
            .at[:l_out, :HIDDEN].set(w1.T)
            .at[x_const, :HIDDEN].set(b1)
            .at[x_const, h_const].set(1.0))

    # out: W2^T; b2 folded into the constant row.
    w2_t = (jnp.zeros((h_pad, a_pad), jnp.float32)
            .at[:HIDDEN, :a_dim].set(w2.T)
            .at[h_const, :a_dim].set(b2))

    # MXU operands in bf16 (f32 accumulation in-kernel); cvec stays f32.
    return (t_pad.astype(jnp.bfloat16), cvec,
            w1_t.astype(jnp.bfloat16), w2_t.astype(jnp.bfloat16))


def anet_forward(s, kernel_params, a_dim):
    """s: (1, B, s_dim) float32 -> (1, B, a_dim) float32."""
    t_pad, cvec, w1_t, w2_t = kernel_params
    assert s.shape[0] == 1, "ANet.forward expects dim-0 of size 1 (single channel)"
    _, B, s_dim = s.shape
    l_pad = t_pad.shape[1]
    h_pad = w1_t.shape[1]
    a_pad = w2_t.shape[1]

    # Batch tiling: multiple-of-8 rows per tile; large batches use >= 2 tiles so
    # the "parallel" axis shards across v7x's two TensorCores; padding waste is
    # bounded by ~8 rows per tile (no round-up to a fixed TB multiple).
    b8 = _round_up(max(B, SUBLANE), SUBLANE)
    n_tiles = _cdiv(b8, TB_MAX)
    if n_tiles == 1 and b8 >= SPLIT_MIN_ROWS:
        n_tiles = 2
    tb = _round_up(_cdiv(b8, n_tiles), SUBLANE)
    b_pad = n_tiles * tb

    # Narrow-output path for large batches (16x less HBM writeback for a_dim=8);
    # lane-dense 128-wide store for tiny, latency-bound batches.
    a_out = a_dim if b_pad >= NARROW_OUT_MIN_ROWS else a_pad

    x = s[0]
    if x.dtype != jnp.float32:
        x = x.astype(jnp.float32)
    if b_pad > B:
        x = jnp.pad(x, ((0, b_pad - B), (0, 0)))

    out = pl.pallas_call(
        anet_kernel,
        out_shape=jax.ShapeDtypeStruct((b_pad, a_out), jnp.float32),
        grid=(n_tiles,),
        in_specs=[
            pl.BlockSpec((tb, s_dim), lambda i: (i, 0)),      # input rows (f32)
            pl.BlockSpec((s_dim, l_pad), lambda i: (0, 0)),   # Toeplitz conv (bf16)
            pl.BlockSpec((1, l_pad), lambda i: (0, 0)),       # conv bias + const lane
            pl.BlockSpec((l_pad, h_pad), lambda i: (0, 0)),   # fc1 W^T (+b1 folded)
            pl.BlockSpec((h_pad, a_pad), lambda i: (0, 0)),   # out W^T (+b2 folded)
        ],
        out_specs=pl.BlockSpec((tb, a_out), lambda i: (i, 0)),
        compiler_params=pltpu.CompilerParams(
            dimension_semantics=("parallel",)),               # v7x: 2 TCs share batch
    )(x, t_pad, cvec, w1_t, w2_t)

    if b_pad > B or a_out > a_dim:
        out = out[:B, :a_dim]
    return out[None]   # (1, B, a_dim)


def anet_reference(s, params):
    """Pure-JAX reference of the PyTorch forward (for correctness check)."""
    cw, cb, w1, b1, w2, b2 = params
    x = s[0].astype(jnp.float32)                                  # (B, s_dim)
    l_out = x.shape[1] - KSIZE + 1
    conv = cb[0]
    for k in range(KSIZE):
        conv = conv + cw[k] * x[:, k:k + l_out]
    x1 = jnp.where(conv > 0, conv, NEG_SLOPE * conv)
    h = x1 @ w1.T + b1
    h = jnp.where(h > 0, h, NEG_SLOPE * h)
    y = h @ w2.T + b2
    return jax.nn.sigmoid(y)[None]                                # (1, B, a_dim)


def init_params(key, s_dim, a_dim):
    """Deterministic synthetic init mirroring ANet.__init__ shapes (PyTorch layout)."""
    l_out = s_dim - KSIZE + 1
    ks = jax.random.split(key, 6)
    # Conv1d(1,1,5): uniform(-1/sqrt(fan_in), 1/sqrt(fan_in)), fan_in = 5
    bc = 1.0 / jnp.sqrt(5.0)
    cw = jax.random.uniform(ks[0], (KSIZE,), jnp.float32, -bc, bc)
    cb = jax.random.uniform(ks[1], (1,), jnp.float32, -bc, bc)
    # fc1: weight.normal_(0, 0.1), bias default uniform
    w1 = (0.1 * jax.random.normal(ks[2], (HIDDEN, l_out))).astype(jnp.float32)
    b1b = 1.0 / jnp.sqrt(float(l_out))
    b1 = jax.random.uniform(ks[3], (HIDDEN,), jnp.float32, -b1b, b1b)
    # out: weight.normal_(0, 0.1), bias default uniform
    w2 = (0.1 * jax.random.normal(ks[4], (a_dim, HIDDEN))).astype(jnp.float32)
    b2b = 1.0 / jnp.sqrt(float(HIDDEN))
    b2 = jax.random.uniform(ks[5], (a_dim,), jnp.float32, -b2b, b2b)
    return cw, cb, w1, b1, w2, b2


if __name__ == "__main__":
    S_DIM = 20      # state dim (conv output length = 16)
    A_DIM = 8       # action dim

    key = jax.random.PRNGKey(0)
    k_param, k_in1, k_in2 = jax.random.split(key, 3)

    params = init_params(k_param, S_DIM, A_DIM)
    kernel_params = prepare_params(params, S_DIM, A_DIM)

    # Small, latency-bound batch (single tile, lane-dense output path).
    s_small = jax.random.normal(k_in1, (1, 8, S_DIM), dtype=jnp.float32)
    out_small = anet_forward(s_small, kernel_params, A_DIM)
    jax.block_until_ready(out_small)
    assert out_small.shape == (1, 8, A_DIM)
    assert bool(jnp.all((out_small >= 0.0) & (out_small <= 1.0)))
    ref_small = anet_reference(s_small, params)
    assert bool(jnp.max(jnp.abs(out_small - ref_small)) < 2e-2)

    # Larger, non-multiple-of-8 batch: exercises the 2-tile (2-TC) split and the
    # narrow (a_dim-wide) output path.
    s_big = jax.random.normal(k_in2, (1, 1100, S_DIM), dtype=jnp.float32)
    out_big = anet_forward(s_big, kernel_params, A_DIM)
    jax.block_until_ready(out_big)
    assert out_big.shape == (1, 1100, A_DIM)
    ref_big = anet_reference(s_big, params)
    assert bool(jnp.max(jnp.abs(out_big - ref_big)) < 2e-2)

    print("KERNEL_OK")
</pallas_src>

<mosaic_0001>
module attributes {stable_mosaic.version = 11 : i64} {
  func.func @anet_kernel(%arg0: i32, %arg1: memref<8x20xf32, #tpu.memory_space<vmem>>, %arg2: memref<20x128xbf16, #tpu.memory_space<vmem>>, %arg3: memref<1x128xf32, #tpu.memory_space<vmem>>, %arg4: memref<128x128xbf16, #tpu.memory_space<vmem>>, %arg5: memref<128x128xbf16, #tpu.memory_space<vmem>>, %arg6: memref<8x128xf32, #tpu.memory_space<vmem>>) attributes {dimension_semantics = [#tpu.dimension_semantics<parallel>], iteration_bounds = array<i64: 1>, scalar_prefetch = 0 : i64, scratch_operands = 0 : i64, tpu.core_type = #tpu.core_type<tc>, window_params = [{transform_indices = @transform_0, window_bounds = array<i64: 8, 20>}, {pipeline_mode = #tpu.pipeline_mode<synchronous>, transform_indices = @transform_1, window_bounds = array<i64: 20, 128>}, {pipeline_mode = #tpu.pipeline_mode<synchronous>, transform_indices = @transform_2, window_bounds = array<i64: 1, 128>}, {pipeline_mode = #tpu.pipeline_mode<synchronous>, transform_indices = @transform_3, window_bounds = array<i64: 128, 128>}, {pipeline_mode = #tpu.pipeline_mode<synchronous>, transform_indices = @transform_4, window_bounds = array<i64: 128, 128>}, {transform_indices = @transform_5, window_bounds = array<i64: 8, 128>}]} {
    %c0 = arith.constant 0 : index
    %c0_0 = arith.constant 0 : index
    %0 = vector.load %arg1[%c0, %c0_0] : memref<8x20xf32, #tpu.memory_space<vmem>>, vector<8x20xf32>
    %1 = arith.truncf %0 : vector<8x20xf32> to vector<8x20xbf16>
    %c0_1 = arith.constant 0 : index
    %c0_2 = arith.constant 0 : index
    %2 = vector.load %arg2[%c0_1, %c0_2] : memref<20x128xbf16, #tpu.memory_space<vmem>>, vector<20x128xbf16>
    %cst = arith.constant dense<0.000000e+00> : vector<8x128xf32>
    %3 = tpu.matmul %1, %2, %cst {dimension_numbers = #tpu.dot_dimension_numbers<[1], [0], [0], [1], [0, 0, 1, 1], [], []>} : vector<8x20xbf16>, vector<20x128xbf16>, vector<8x128xf32> -> vector<8x128xf32>
    %c0_3 = arith.constant 0 : index
    %c0_4 = arith.constant 0 : index
    %4 = vector.load %arg3[%c0_3, %c0_4] : memref<1x128xf32, #tpu.memory_space<vmem>>, vector<1x128xf32>
    %5 = vector.broadcast %4 : vector<1x128xf32> to vector<8x128xf32>
    %6 = arith.addf %3, %5 : vector<8x128xf32>
    %cst_5 = arith.constant 0.000000e+00 : f32
    %7 = vector.broadcast %cst_5 : f32 to vector<8x128xf32>
    %8 = arith.cmpf ogt, %6, %7 : vector<8x128xf32>
    %cst_6 = arith.constant 0.00999999977 : f32
    %9 = vector.broadcast %cst_6 : f32 to vector<8x128xf32>
    %10 = arith.mulf %9, %6 : vector<8x128xf32>
    %11 = arith.select %8, %6, %10 : vector<8x128xi1>, vector<8x128xf32>
    %12 = arith.truncf %11 : vector<8x128xf32> to vector<8x128xbf16>
    %c0_7 = arith.constant 0 : index
    %c0_8 = arith.constant 0 : index
    %13 = vector.load %arg4[%c0_7, %c0_8] : memref<128x128xbf16, #tpu.memory_space<vmem>>, vector<128x128xbf16>
    %cst_9 = arith.constant dense<0.000000e+00> : vector<8x128xf32>
    %14 = tpu.matmul %12, %13, %cst_9 {dimension_numbers = #tpu.dot_dimension_numbers<[1], [0], [0], [1], [0, 0, 1, 1], [], []>} : vector<8x128xbf16>, vector<128x128xbf16>, vector<8x128xf32> -> vector<8x128xf32>
    %cst_10 = arith.constant 0.000000e+00 : f32
    %15 = vector.broadcast %cst_10 : f32 to vector<8x128xf32>
    %16 = arith.cmpf ogt, %14, %15 : vector<8x128xf32>
    %cst_11 = arith.constant 0.00999999977 : f32
    %17 = vector.broadcast %cst_11 : f32 to vector<8x128xf32>
    %18 = arith.mulf %17, %14 : vector<8x128xf32>
    %19 = arith.select %16, %14, %18 : vector<8x128xi1>, vector<8x128xf32>
    %20 = arith.truncf %19 : vector<8x128xf32> to vector<8x128xbf16>
    %c0_12 = arith.constant 0 : index
    %c0_13 = arith.constant 0 : index
    %21 = vector.load %arg5[%c0_12, %c0_13] : memref<128x128xbf16, #tpu.memory_space<vmem>>, vector<128x128xbf16>
    %cst_14 = arith.constant dense<0.000000e+00> : vector<8x128xf32>
    %22 = tpu.matmul %20, %21, %cst_14 {dimension_numbers = #tpu.dot_dimension_numbers<[1], [0], [0], [1], [0, 0, 1, 1], [], []>} : vector<8x128xbf16>, vector<128x128xbf16>, vector<8x128xf32> -> vector<8x128xf32>
    %23 = arith.negf %22 : vector<8x128xf32>
    %24 = math.exp %23 : vector<8x128xf32>
    %cst_15 = arith.constant 1.000000e+00 : f32
    %25 = vector.broadcast %cst_15 : f32 to vector<8x128xf32>
    %26 = arith.addf %25, %24 : vector<8x128xf32>
    %27 = arith.divf %25, %26 : vector<8x128xf32>
    %c0_16 = arith.constant 0 : index
    %c0_17 = arith.constant 0 : index
    %28 = vector.load %arg6[%c0_16, %c0_17] : memref<8x128xf32, #tpu.memory_space<vmem>>, vector<8x128xf32>
    tpu.vector_store %arg6[%c0_16, %c0_17], %27 {strides = array<i32>} : memref<8x128xf32, #tpu.memory_space<vmem>>, vector<8x128xf32>,
    return
  }
  func.func @transform_0(%arg0: i32) -> (i32, i32) {
    %c0_i32 = arith.constant 0 : i32
    %c0_i32_0 = arith.constant 0 : i32
    return %arg0, %c0_i32 : i32, i32
  }
  func.func @transform_1(%arg0: i32) -> (i32, i32) {
    %c0_i32 = arith.constant 0 : i32
    %c0_i32_0 = arith.constant 0 : i32
    %c0_i32_1 = arith.constant 0 : i32
    return %c0_i32, %c0_i32_0 : i32, i32
  }
  func.func @transform_2(%arg0: i32) -> (i32, i32) {
    %c0_i32 = arith.constant 0 : i32
    %c0_i32_0 = arith.constant 0 : i32
    %c0_i32_1 = arith.constant 0 : i32
    return %c0_i32, %c0_i32_0 : i32, i32
  }
  func.func @transform_3(%arg0: i32) -> (i32, i32) {
    %c0_i32 = arith.constant 0 : i32
    %c0_i32_0 = arith.constant 0 : i32
    %c0_i32_1 = arith.constant 0 : i32
    return %c0_i32, %c0_i32_0 : i32, i32
  }
  func.func @transform_4(%arg0: i32) -> (i32, i32) {
    %c0_i32 = arith.constant 0 : i32
    %c0_i32_0 = arith.constant 0 : i32
    %c0_i32_1 = arith.constant 0 : i32
    return %c0_i32, %c0_i32_0 : i32, i32
  }
  func.func @transform_5(%arg0: i32) -> (i32, i32) {
    %c0_i32 = arith.constant 0 : i32
    %c0_i32_0 = arith.constant 0 : i32
    return %arg0, %c0_i32 : i32, i32
  }
}

</mosaic_0001>

<bundles_post_ra>
// kernel: tpu_custom_call.1
= control target key start
LH: loop header
LB: loop body
LE: loop exit
PB: predicated region body
PF: predicated region fallthrough
CT: control target
= control target key end

     0   :  { %10 = vsyncpa [#allocation3], 0  ;;  %s737_s0 = inlined_call_operand.hbm [shape: f32[8,20], index: 0, kind: input, shape index: {}]   ;;  %s738_s1 = inlined_call_operand.hbm [shape: bf16[20,128], index: 1, kind: input, shape index: {}]   ;;  %s739_s2 = inlined_call_operand.vmem [shape: f32[1,128], index: 2, kind: input, shape index: {}]   ;;  %s740_s3 = inlined_call_operand.hbm [shape: bf16[128,128], index: 3, kind: input, shape index: {}]   ;;  %s741_s4 = inlined_call_operand.hbm [shape: bf16[128,128], index: 4, kind: input, shape index: {}]   ;;  %s742_s5 = inlined_call_operand.hbm [shape: f32[8,128], index: 5, kind: output, shape index: {}]  }
   0x1   :  { %11 = vsyncpa [#allocation6], 0 }
   0x2   :  { %12 = vsyncpa [#allocation9], 0 }
   0x3   :  { %13 = vsyncpa [#allocation4], 0  ;;  %s623_s18 = smov [#allocation5]   ;;  %s505_s22 = scalar_lea.hbm %s738_s1, 192 }
   0x4   :  { %s29_s19 = sshll.u32 %s623_s18, 4  ;;  %p506_p0 = scmp.ne.s32.totalorder %s738_s1, %s505_s22  ;;  %s30_s19 = int_to_ptr.vmem [resolvable:$true] %s29_s19 }
   0x5   :  { %p509_p1 = scmp.lt.u32.totalorder %s505_s22, %s738_s1 }
   0x7   :  { %p511_p2 = pnand %p509_p1, %p506_p0 }
   0x9   :  { %514 = shalt.err (!%p511_p2)
}
   0xa   :  { %s515_s27 = scalar_lea.vmem %s30_s19, 192  ;;  %p520_p4 = scmp.lt.s32.totalorder %s30_s19, %s30_s19 }
   0xb   :  { %p516_p3 = scmp.ne.s32.totalorder %s30_s19, %s515_s27  ;;  %p521_p5 = scmp.lt.s32.totalorder %s515_s27, %s515_s27 }
   0xd   :  { %p522_p6 = por %p521_p5, %p520_p4 }
   0xf   :  { %p523_p7 = pnand %p522_p6, %p516_p3 }
  0x11   :  { %526 = shalt.err (!%p523_p7)
}
  0x12   :  { %s624_s28 = smov 64   ;;  %s625_s29 = smov 4  }
  0x13   :  { %35 = dma.hbm_to_vmem [thread:$0]  %s738_s1, 192, %s30_s19, [#allocation6], %s624_s28, %s624_s28, %s625_s29  }
  0x14   :  { %s626_s7 = smov [#allocation2]   ;;  %s627_s9 = smov [#allocation7]  }
  0x15   :  { %s20_s8 = sshll.u32 %s626_s7, 4  ;;  %s43_s10 = sshll.u32 %s627_s9, 4  ;;  %s21_s8 = int_to_ptr.vmem [resolvable:$true] %s20_s8  ;;  %s44_s10 = int_to_ptr.vmem [resolvable:$true] %s43_s10 }
  0x16   :  { %s527_s13 = scalar_lea.hbm %s737_s0, 128 }
  0x17   :  { %p528_p8 = scmp.ne.s32.totalorder %s737_s0, %s527_s13  ;;  %p531_p9 = scmp.lt.u32.totalorder %s527_s13, %s737_s0 }
  0x19   :  { %p533_p10 = pnand %p531_p9, %p528_p8 }
  0x1b   :  { %536 = shalt.err (!%p533_p10)
}
  0x1c   :  { %s537_s1 = scalar_lea.vmem %s21_s8, 128  ;;  %p542_p12 = scmp.lt.s32.totalorder %s21_s8, %s21_s8 }
  0x1d   :  { %p538_p11 = scmp.ne.s32.totalorder %s21_s8, %s537_s1  ;;  %p543_p13 = scmp.lt.s32.totalorder %s537_s1, %s537_s1 }
  0x1f   :  { %p544_p0 = por %p543_p13, %p542_p12 }
  0x21   :  { %p545_p1 = pnand %p544_p0, %p538_p11 }
  0x23   :  { %548 = shalt.err (!%p545_p1)
}
  0x24   :  { %23 = dma.hbm_to_vmem [thread:$0]  %s737_s0, 128, %s21_s8, [#allocation3]  }
  0x25   :  { %s549_s22 = scalar_lea.hbm %s740_s3, 1024 }
  0x26   :  { %p550_p2 = scmp.ne.s32.totalorder %s740_s3, %s549_s22  ;;  %p553_p3 = scmp.lt.u32.totalorder %s549_s22, %s740_s3 }
  0x28   :  { %p555_p4 = pnand %p553_p3, %p550_p2 }
  0x2a   :  { %558 = shalt.err (!%p555_p4)
}
  0x2b   :  { %s559_s27 = scalar_lea.vmem %s44_s10, 1024  ;;  %p564_p6 = scmp.lt.s32.totalorder %s44_s10, %s44_s10 }
  0x2c   :  { %p560_p5 = scmp.ne.s32.totalorder %s44_s10, %s559_s27  ;;  %p565_p7 = scmp.lt.s32.totalorder %s559_s27, %s559_s27 }
  0x2e   :  { %p566_p8 = por %p565_p7, %p564_p6 }
  0x30   :  { %p567_p9 = pnand %p566_p8, %p560_p5 }
  0x32   :  { %570 = shalt.err (!%p567_p9)
}
  0x33   :  { %49 = dma.hbm_to_vmem [thread:$0]  %s740_s3, 1024, %s44_s10, [#allocation6], %s624_s28, %s624_s28, %s625_s29  }
  0x34   :  { %s628_s6 = smov [#allocation8]   ;;  %s571_s11 = scalar_lea.hbm %s741_s4, 1024 }
  0x35   :  { %s55_s7 = sshll.u32 %s628_s6, 4  ;;  %p572_p10 = scmp.ne.s32.totalorder %s741_s4, %s571_s11  ;;  %s56_s7 = int_to_ptr.vmem [resolvable:$true] %s55_s7 }
  0x36   :  { %p575_p11 = scmp.lt.u32.totalorder %s571_s11, %s741_s4 }
  0x38   :  { %p577_p12 = pnand %p575_p11, %p572_p10 }
  0x3a   :  { %580 = shalt.err (!%p577_p12)
}
  0x3b   :  { %s581_s16 = scalar_lea.vmem %s56_s7, 1024  ;;  %p586_p0 = scmp.lt.s32.totalorder %s56_s7, %s56_s7 }
  0x3c   :  { %p582_p13 = scmp.ne.s32.totalorder %s56_s7, %s581_s16  ;;  %p587_p1 = scmp.lt.s32.totalorder %s581_s16, %s581_s16 }
  0x3e   :  { %p588_p2 = por %p587_p1, %p586_p0 }
  0x40   :  { %p589_p3 = pnand %p588_p2, %p582_p13 }
  0x42   :  { %592 = shalt.err (!%p589_p3)
}
  0x43   :  { %61 = dma.hbm_to_vmem [thread:$0]  %s741_s4, 1024, %s56_s7, [#allocation9], %s624_s28, %s624_s28, %s625_s29  }
  0x44   :  { %615 = dma.done.wait [#allocation3], 128  }
  0x45   :  { %616 = vsyncadd [#allocation3], 4294967168 }
  0x46   :  { %617 = dma.done.wait [#allocation6], 1216  }
  0x47   :  { %618 = vsyncadd [#allocation6], 4294966080 }
  0x48   :  { %619 = dma.done.wait [#allocation9], 1024  }
  0x49   :  { %620 = vsyncadd [#allocation9], 4294966272  ;;  %v629_v0 = vmov 0.0   ;;  %vm630_vm0 = vmmov 0   ;;  %v483_v1 = vld [vmem:[#allocation5] sm:$0xff]   ;;  %vm100_vm1 = vcmask 1041408  }
  0x4a   :  { %426 = vmatprep.subr.bf16.mxu0 %v629_v0  ;;  %430 = vmatprep.mubr.msk.bf16.mxu0 %vm630_vm0, %v629_v0  ;;  %v484_v2 = vld [vmem:[#allocation5 + $0x8] ss:$0 sps:$4 sm:$0x33]   ;;  %v75_v3 = vld [vmem:[#allocation2] sm:$0xff]  ;;  %v485_v4 = vld [vmem:[#allocation7] sm:$0xff]   ;;  %vm96_vm2 = vcmask 162816  }
  0x4b   :  { %434 = vmatprep.subr.bf16.mxu1 %v629_v0  ;;  %450 = vmatprep.mubr.msk.bf16.mxu1 %vm630_vm0, %v629_v0  ;;  %v102_v5 = vsel %vm100_vm1, %v484_v2, 0  ;;  %v486_v6 = vld [vmem:[#allocation7 + $0x8] sm:$0xff]   ;;  %v76_v7 = vpack.c.bf16 %v75_v3, %v75_v3  ;;  %v487_v8 = vld [vmem:[#allocation7 + $0x10] sm:$0xff]   ;;  %v488_v9 = vld [vmem:[#allocation7 + $0x18] sm:$0xff]  }
  0x4c   :  { %427 = vmatpush3.bf16.msra.mxu0 %v483_v1  ;;  %435 = vmatpush3.bf16.msra.mxu1 %v485_v4  ;;  %v489_v10 = vld [vmem:[#allocation7 + $0x20] sm:$0xff]   ;;  %v490_v11 = vld [vmem:[#allocation7 + $0x28] sm:$0xff]   ;;  %v491_v12 = vld [vmem:[#allocation7 + $0x30] sm:$0xff]  }
  0x4d   :  { %428 = vmatprep.subr.bf16.mxu0 %v629_v0  ;;  %436 = vmatprep.subr.bf16.mxu1 %v629_v0  ;;  %v492_v13 = vld [vmem:[#allocation7 + $0x38] sm:$0xff]   ;;  %v493_v14 = vld [vmem:[#allocation8] sm:$0xff]   ;;  %v494_v15 = vld [vmem:[#allocation8 + $0x8] sm:$0xff]  }
  0x4e   :  { %v495_v16 = vld [vmem:[#allocation8 + $0x10] sm:$0xff]   ;;  %v496_v17 = vld [vmem:[#allocation8 + $0x18] sm:$0xff]   ;;  %v497_v18 = vld [vmem:[#allocation8 + $0x20] sm:$0xff]  }
  0x4f   :  { %v498_v19 = vld [vmem:[#allocation8 + $0x28] sm:$0xff]   ;;  %v499_v20 = vld [vmem:[#allocation8 + $0x30] sm:$0xff]   ;;  %v500_v30 = vld [vmem:[#allocation8 + $0x38] sm:$0xff]  }
  0x50   :  { %429 = vmatpush3.bf16.msra.mxu0 %v102_v5  ;;  %437 = vmatpush3.bf16.msra.mxu1 %v486_v6  ;;  %v384_v21 = vld [vmem:[%s739_s2] ss:$0 sm:$0xff]  ;;  %s631_s2 = smov [#allocation10]  }
  0x51   :  { %454 = vmatprep.subr.bf16.mxu0 %v629_v0  ;;  %438 = vmatprep.subr.bf16.mxu1 %v629_v0  ;;  %s373_s29 = sshll.u32 %s631_s2, 4  ;;  %s374_s29 = int_to_ptr.vmem [resolvable:$true] %s373_s29 }
  0x52   :  { %s593_s17 = scalar_lea.vmem %s374_s29, 128  ;;  %p598_p5 = scmp.lt.s32.totalorder %s374_s29, %s374_s29 }
  0x53   :  { %431 = vmatmul.mubr.msk.bf16.vlgmr.msra.gmra.mrb[0].mxu0 %vm96_vm2, %v76_v7  ;;  %p594_p4 = scmp.ne.s32.totalorder %s374_s29, %s593_s17  ;;  %p599_p6 = scmp.lt.s32.totalorder %s593_s17, %s593_s17 }
  0x54   :  { %470 = vmatprep.mubr.msk.bf16.mxu0 %vm630_vm0, %v629_v0  ;;  %439 = vmatpush3.bf16.msra.mxu1 %v487_v8 }
  0x55   :  { %440 = vmatprep.subr.bf16.mxu1 %v629_v0  ;;  %455 = vmatpush3.bf16.msra.mxu0 %v493_v14  ;;  %p600_p7 = por %p599_p6, %p598_p5 }
  0x56   :  { %456 = vmatprep.subr.bf16.mxu0 %v629_v0 }
  0x57   :  { %p601_p8 = pnand %p600_p7, %p594_p4 }
  0x58   :  { %441 = vmatpush3.bf16.msra.mxu1 %v488_v9 }
  0x59   :  { %442 = vmatprep.subr.bf16.mxu1 %v629_v0  ;;  %457 = vmatpush3.bf16.msra.mxu0 %v494_v15 }
  0x5a   :  { %458 = vmatprep.subr.bf16.mxu0 %v629_v0 }
  0x5c   :  { %443 = vmatpush3.bf16.msra.mxu1 %v489_v10 }
  0x5d   :  { %444 = vmatprep.subr.bf16.mxu1 %v629_v0  ;;  %459 = vmatpush3.bf16.msra.mxu0 %v495_v16 }
  0x5e   :  { %460 = vmatprep.subr.bf16.mxu0 %v629_v0 }
  0x60   :  { %445 = vmatpush3.bf16.msra.mxu1 %v490_v11 }
  0x61   :  { %446 = vmatprep.subr.bf16.mxu1 %v629_v0  ;;  %461 = vmatpush3.bf16.msra.mxu0 %v496_v17 }
  0x62   :  { %462 = vmatprep.subr.bf16.mxu0 %v629_v0 }
  0x64   :  { %447 = vmatpush3.bf16.msra.mxu1 %v491_v12 }
  0x65   :  { %448 = vmatprep.subr.bf16.mxu1 %v629_v0  ;;  %463 = vmatpush3.bf16.msra.mxu0 %v497_v18 }
  0x66   :  { %464 = vmatprep.subr.bf16.mxu0 %v629_v0 }
  0x68   :  { %449 = vmatpush3.bf16.msra.mxu1 %v492_v13 }
  0x69   :  { %465 = vmatpush3.bf16.msra.mxu0 %v498_v19 }
  0x6a   :  { %466 = vmatprep.subr.bf16.mxu0 %v629_v0 }
  0x6d   :  { %467 = vmatpush3.bf16.msra.mxu0 %v499_v20 }
  0x6e   :  { %468 = vmatprep.subr.bf16.mxu0 %v629_v0 }
  0x71   :  { %469 = vmatpush3.bf16.msra.mxu0 %v500_v30 }
 0x126   :  { %v138_v22 = vpop.f32.mrb[0].mxu0 }
 0x127   :  { %v139_v23 = vadd.f32 %v384_v21, %v138_v22  ;;  %v432_v24 = vpop.f32.mrb[1].mxu0 }
 0x128   :  { %v141_v25 = vpop.f32.mrb[2].mxu0 }
 0x129   :  { %vm144_vm3 = vcmp.gt.f32.partialorder %v139_v23, 0.0  ;;  %v145_v26 = vmul.f32 0.01, %v139_v23  ;;  %v433_v27 = vpop.f32.mrb[3].mxu0 }
 0x12b   :  { %v146_v28 = vsel %vm144_vm3, %v139_v23, %v145_v26 }
 0x12c   :  { %v147_v29 = vpack.c.bf16 %v146_v28, %v146_v28 }
 0x12e   :  { %451 = vmatmul.mubr.bf16.vlgmr.msra.gmra.mrb[0].mxu1 %v147_v29 }
 0x201   :  { %v246_v31 = vpop.f32.mrb[0].mxu1 }
 0x202   :  { %vm252_vm4 = vcmp.gt.f32.partialorder %v246_v31, 0.0  ;;  %v253_v32 = vmul.f32 0.01, %v246_v31  ;;  %v452_v33 = vpop.f32.mrb[1].mxu1 }
 0x203   :  { %v249_v34 = vpop.f32.mrb[2].mxu1 }
 0x204   :  { %v254_v35 = vsel %vm252_vm4, %v246_v31, %v253_v32  ;;  %v453_v36 = vpop.f32.mrb[3].mxu1 }
 0x205   :  { %v255_v37 = vpack.c.bf16 %v254_v35, %v254_v35 }
 0x207   :  { %471 = vmatmul.mubr.bf16.vlgmr.msra.gmra.mrb[4].mxu0 %v255_v37 }
 0x2da   :  { %v354_v38 = vpop.f32.mrb[4].mxu0 }
 0x2db   :  { %v404_v39 = vmul.f32 -1.442695, %v354_v38  ;;  %v472_v40 = vpop.f32.mrb[5].mxu0 }
 0x2dc   :  { %v357_v41 = vpop.f32.mrb[6].mxu0 }
 0x2dd   :  { %501 = vpow2.f32 %v404_v39  ;;  %v473_v42 = vpop.f32.mrb[7].mxu0 }
 0x2e7   :  { %v502_v43 = vpop.eup %501 }
 0x2e8   :  { %v363_v44 = vadd.f32 1.0, %v502_v43 }
 0x2ea   :  { %503 = vrcp.f32 %v363_v44 }
 0x2f4   :  { %v504_v45 = vpop.eup %503 }
 0x2f5   :  { %366 = vst [vmem:[#allocation10] sm:$0xff] %v504_v45 }
 0x2f6   :  { %604 = shalt.err (!%p601_p8)
}
 0x2f7   :  { %s605_s19 = scalar_lea.hbm %s742_s5, 128 }
 0x2f8   :  { %p606_p9 = scmp.ne.s32.totalorder %s742_s5, %s605_s19  ;;  %p609_p10 = scmp.lt.u32.totalorder %s605_s19, %s742_s5 }
 0x2fa   :  { %p611_p11 = pnand %p609_p10, %p606_p9 }
 0x2fc   :  { %614 = shalt.err (!%p611_p11)
}
 0x2fd   :  { %376 = dma.vmem_to_hbm [thread:$0]  %s374_s29, 128, %s742_s5, [#allocation4]  }
 0x2fe   :  { %621 = dma.done.wait [#allocation4], 128  }
 0x2ff   :  { %622 = vsyncadd [#allocation4], 4294967168 }
 0x300   :  { %380 = vsyncpa [#allocation3], 1 }
 0x301   :  { %381 = vsyncpa [#allocation6], 1 }
 0x302   :  { %382 = vsyncpa [#allocation9], 1 }
 0x303   :  { %383 = vsyncpa [#allocation4], 1 }

</bundles_post_ra>
